<compile_context>
chip_gen: v5e
topology: v5e:2x2
jax: 0.10.0
libtpu: 0.0.40
codegen_flags: <defaults>
</compile_context>

<pallas_src>
import functools

import jax
import jax.numpy as jnp
from jax.experimental import pallas as pl
from jax.experimental.pallas import tpu as pltpu

LN_EPS = 1e-5


def _ode_func_kernel(xT_ref,
                     w1_ref, b1_ref, g1_ref, be1_ref,
                     w2_ref, b2_ref, g2_ref, be2_ref,
                     w3_ref, b3_ref,
                     oT_ref):
    """Fused MLP on transposed (features, batch) tiles:
       (Linear -> LayerNorm -> tanh) x 2, then Linear.  All math in f32."""
    h = xT_ref[...].astype(jnp.float32)                   # (D_in, block_b)

    def lin_ln_tanh(h, w_r, b_r, g_r, be_r):
        # Linear: W @ h on the MXU, f32 accumulation.
        h = jnp.dot(w_r[...], h, preferred_element_type=jnp.float32) + b_r[...]
        # LayerNorm over the feature axis (axis 0 in the transposed layout),
        # two-pass statistics (center, then square+reduce) for PyTorch-like numerics.
        inv_n = 1.0 / h.shape[0]
        mu = jnp.sum(h, axis=0, keepdims=True) * inv_n
        hc = h - mu
        var = jnp.sum(hc * hc, axis=0, keepdims=True) * inv_n
        hn = hc * jax.lax.rsqrt(var + LN_EPS)
        hn = hn * g_r[...] + be_r[...]
        # latent activation (tanh) on the EUP.
        return jnp.tanh(hn)

    h = lin_ln_tanh(h, w1_ref, b1_ref, g1_ref, be1_ref)
    h = lin_ln_tanh(h, w2_ref, b2_ref, g2_ref, be2_ref)

    # Final layer: Linear only (norm = Identity, act = linear).
    out = jnp.dot(w3_ref[...], h, preferred_element_type=jnp.float32) + b3_ref[...]
    oT_ref[...] = out.astype(oT_ref.dtype)                 # lane-dense store


def _round_up(v, m):
    return ((v + m - 1) // m) * m


def _choose_tiling(B, block_b):
    """Pick a batch (lane) tile: always a multiple of 128.

    Single grid step when the padded batch fits in one tile (<= block_b lanes);
    otherwise split into the fewest >=512-lane tiles (grid steps) possible.
    """
    block_b = max(128, _round_up(block_b, 128))
    Bp = _round_up(max(B, 1), 128)
    if Bp <= block_b:
        return Bp, Bp, 1                       # block, padded batch, grid
    grid = -(-Bp // block_b)                   # ceil div
    block = _round_up(-(-Bp // grid), 128)     # even split, re-aligned to 128
    return block, block * grid, grid


def _call_kernel(xT, params, block, Bp, grid, fuse_input):
    (w1, b1, g1, be1, w2, b2, g2, be2, w3, b3) = params
    D_in = xT.shape[0]
    H1, H2, D_out = w1.shape[0], w2.shape[0], w3.shape[0]

    # Weights / biases / LN params: constant index maps -> stay resident in VMEM.
    full = lambda shape: pl.BlockSpec(shape, lambda i: (0, 0))

    grid_spec = pltpu.PrefetchScalarGridSpec(
        num_scalar_prefetch=0,
        grid=(grid,),
        in_specs=[
            pl.BlockSpec((D_in, block), lambda i: (0, i)),                    # x^T tile
            full((H1, D_in)), full((H1, 1)), full((H1, 1)), full((H1, 1)),    # layer 1
            full((H2, H1)),   full((H2, 1)), full((H2, 1)), full((H2, 1)),    # layer 2
            full((D_out, H2)), full((D_out, 1)),                               # layer 3
        ],
        out_specs=pl.BlockSpec((D_out, block), lambda i: (0, i)),
    )

    # allow_input_fusion: one bool per operand; let XLA fuse the transpose/pad
    # producing the x^T operand into the pallas call instead of materializing it.
    allow_fusion = [bool(fuse_input)] + [False] * 10

    return pl.pallas_call(
        _ode_func_kernel,
        out_shape=jax.ShapeDtypeStruct((D_out, Bp), xT.dtype),
        grid_spec=grid_spec,
        compiler_params=pltpu.CompilerParams(
            dimension_semantics=("parallel",),
            allow_input_fusion=allow_fusion,
        ),
    )(xT, w1, b1, g1, be1, w2, b2, g2, be2, w3, b3)


@functools.partial(jax.jit, static_argnames=("block_b",))
def ode_function_forward_T(t, xT, params, *, block_b=1024):
    """Primary entry point: state kept in (features, batch) layout.

    No transposes at all; no padding when B is a multiple of 128.  An ODE solver
    should keep its state in this layout across the whole solve.  `t` is unused
    (matches the PyTorch forward signature).
    """
    del t
    _, B = xT.shape
    block, Bp, grid = _choose_tiling(B, block_b)
    if Bp != B:
        xT = jnp.pad(xT, ((0, 0), (0, Bp - B)))
    outT = _call_kernel(xT, params, block, Bp, grid, fuse_input=True)
    if Bp != B:
        outT = outT[:, :B]
    return outT


@functools.partial(jax.jit, static_argnames=("block_b",))
def ode_function_forward(t, x, params, *, block_b=1024):
    """Convenience wrapper for the standard (batch, features) layout."""
    return ode_function_forward_T(t, x.T, params, block_b=block_b).T


def make_params(key, latent_dim, num_hidden, num_layers):
    """Deterministic synthetic params matching the module's shapes.

    Weights in PyTorch layout (n_out, n_in); bias / LayerNorm gamma/beta as (n_out, 1).
    """
    assert num_layers == 2, "kernel specialized to num_layers=2 (fuses 3 Linear layers)"
    dims = [latent_dim] + num_layers * [num_hidden] + [latent_dim]
    keys = jax.random.split(key, 2 * (num_layers + 1))
    params = []
    for i, (n_in, n_out) in enumerate(zip(dims[:-1], dims[1:])):
        kw, kb = keys[2 * i], keys[2 * i + 1]
        scale = 1.0 / jnp.sqrt(n_in)
        w = jax.random.uniform(kw, (n_out, n_in), jnp.float32, -scale, scale)
        b = jax.random.uniform(kb, (n_out, 1), jnp.float32, -scale, scale)
        params += [w, b]
        if i < num_layers:
            gamma = jnp.ones((n_out, 1), jnp.float32)
            beta = jnp.zeros((n_out, 1), jnp.float32)
            params += [gamma, beta]
    return tuple(params)


def reference_forward(t, x, params):
    """Pure-JAX reference (standard (B, D) layout) for correctness checking."""
    del t
    (w1, b1, g1, be1, w2, b2, g2, be2, w3, b3) = params
    hp = jax.lax.Precision.HIGHEST

    def ln(h, g, be):
        mu = jnp.mean(h, axis=-1, keepdims=True)
        var = jnp.mean(jnp.square(h - mu), axis=-1, keepdims=True)
        return (h - mu) * jax.lax.rsqrt(var + LN_EPS) * g.T + be.T

    h = jnp.tanh(ln(jnp.dot(x, w1.T, precision=hp) + b1.T, g1, be1))
    h = jnp.tanh(ln(jnp.dot(h, w2.T, precision=hp) + b2.T, g2, be2))
    return jnp.dot(h, w3.T, precision=hp) + b3.T


if __name__ == "__main__":
    # Config: args.latent_dim=16, args.num_hidden=32, args.num_layers=2.
    latent_dim, num_hidden, num_layers = 16, 32, 2

    key = jax.random.PRNGKey(0)
    kx, kp = jax.random.split(key)
    params = make_params(kp, latent_dim, num_hidden, num_layers)
    t = jnp.float32(0.0)  # unused by the dynamics function

    # Tolerance covers MXU f32 pass decomposition vs the HIGHEST-precision reference.
    TOL = dict(atol=1e-3, rtol=1e-3)

    # Case 1: batch multiple of 128 -> no padding, single grid step.
    batch = 256
    x = jax.random.normal(kx, (batch, latent_dim), dtype=jnp.float32)
    ref = reference_forward(t, x, params)
    out = jax.block_until_ready(ode_function_forward(t, x, params))
    assert out.shape == (batch, latent_dim)
    assert jnp.allclose(out, ref, **TOL), "kernel mismatch vs reference (B=256)"

    # Case 2: ragged batch -> exercises lane padding + output slicing.
    batch2 = 200
    x2 = jax.random.normal(jax.random.PRNGKey(1), (batch2, latent_dim), dtype=jnp.float32)
    ref2 = reference_forward(t, x2, params)
    out2 = jax.block_until_ready(ode_function_forward(t, x2, params))
    assert out2.shape == (batch2, latent_dim)
    assert jnp.allclose(out2, ref2, **TOL), "kernel mismatch vs reference (B=200)"

    # Case 3: transposed (features, batch) state layout — zero-copy solver path.
    outT = jax.block_until_ready(ode_function_forward_T(t, x.T, params))
    assert outT.shape == (latent_dim, batch)
    assert jnp.allclose(outT.T, ref, **TOL), "transposed-layout kernel mismatch"

    print("KERNEL_OK")
</pallas_src>

<mosaic_0001>
module attributes {stable_mosaic.version = 11 : i64} {
  func.func @_ode_func_kernel(%arg0: i32, %arg1: memref<16x256xf32, #tpu.memory_space<vmem>>, %arg2: memref<32x16xf32, #tpu.memory_space<vmem>>, %arg3: memref<32x1xf32, #tpu.memory_space<vmem>>, %arg4: memref<32x1xf32, #tpu.memory_space<vmem>>, %arg5: memref<32x1xf32, #tpu.memory_space<vmem>>, %arg6: memref<32x32xf32, #tpu.memory_space<vmem>>, %arg7: memref<32x1xf32, #tpu.memory_space<vmem>>, %arg8: memref<32x1xf32, #tpu.memory_space<vmem>>, %arg9: memref<32x1xf32, #tpu.memory_space<vmem>>, %arg10: memref<16x32xf32, #tpu.memory_space<vmem>>, %arg11: memref<16x1xf32, #tpu.memory_space<vmem>>, %arg12: memref<16x256xf32, #tpu.memory_space<vmem>>) attributes {dimension_semantics = [#tpu.dimension_semantics<parallel>], iteration_bounds = array<i64: 1>, scalar_prefetch = 0 : i64, scratch_operands = 0 : i64, tpu.core_type = #tpu.core_type<tc>, window_params = [{transform_indices = @transform_0, window_bounds = array<i64: 16, 256>}, {pipeline_mode = #tpu.pipeline_mode<synchronous>, transform_indices = @transform_1, window_bounds = array<i64: 32, 16>}, {pipeline_mode = #tpu.pipeline_mode<synchronous>, transform_indices = @transform_2, window_bounds = array<i64: 32, 1>}, {pipeline_mode = #tpu.pipeline_mode<synchronous>, transform_indices = @transform_3, window_bounds = array<i64: 32, 1>}, {pipeline_mode = #tpu.pipeline_mode<synchronous>, transform_indices = @transform_4, window_bounds = array<i64: 32, 1>}, {pipeline_mode = #tpu.pipeline_mode<synchronous>, transform_indices = @transform_5, window_bounds = array<i64: 32, 32>}, {pipeline_mode = #tpu.pipeline_mode<synchronous>, transform_indices = @transform_6, window_bounds = array<i64: 32, 1>}, {pipeline_mode = #tpu.pipeline_mode<synchronous>, transform_indices = @transform_7, window_bounds = array<i64: 32, 1>}, {pipeline_mode = #tpu.pipeline_mode<synchronous>, transform_indices = @transform_8, window_bounds = array<i64: 32, 1>}, {pipeline_mode = #tpu.pipeline_mode<synchronous>, transform_indices = @transform_9, window_bounds = array<i64: 16, 32>}, {pipeline_mode = #tpu.pipeline_mode<synchronous>, transform_indices = @transform_10, window_bounds = array<i64: 16, 1>}, {transform_indices = @transform_11, window_bounds = array<i64: 16, 256>}]} {
    %c0 = arith.constant 0 : index
    %c0_0 = arith.constant 0 : index
    %0 = vector.load %arg1[%c0, %c0_0] : memref<16x256xf32, #tpu.memory_space<vmem>>, vector<16x256xf32>
    %c0_1 = arith.constant 0 : index
    %c0_2 = arith.constant 0 : index
    %1 = vector.load %arg2[%c0_1, %c0_2] : memref<32x16xf32, #tpu.memory_space<vmem>>, vector<32x16xf32>
    %cst = arith.constant dense<0.000000e+00> : vector<32x256xf32>
    %2 = tpu.matmul %1, %0, %cst {dimension_numbers = #tpu.dot_dimension_numbers<[1], [0], [0], [1], [0, 0, 1, 1], [], []>} : vector<32x16xf32>, vector<16x256xf32>, vector<32x256xf32> -> vector<32x256xf32>
    %c0_3 = arith.constant 0 : index
    %c0_4 = arith.constant 0 : index
    %3 = vector.load %arg3[%c0_3, %c0_4] : memref<32x1xf32, #tpu.memory_space<vmem>>, vector<32x1xf32>
    %4 = vector.broadcast %3 : vector<32x1xf32> to vector<32x256xf32>
    %5 = arith.addf %2, %4 : vector<32x256xf32>
    %cst_5 = arith.constant dense<0.000000e+00> : vector<256xf32>
    %6 = vector.multi_reduction <add>, %5, %cst_5 [0] : vector<32x256xf32> to vector<256xf32>
    %7 = vector.shape_cast %6 : vector<256xf32> to vector<1x256xf32>
    %cst_6 = arith.constant 3.125000e-02 : f32
    %8 = vector.broadcast %cst_6 : f32 to vector<1x256xf32>
    %9 = arith.mulf %7, %8 : vector<1x256xf32>
    %10 = vector.broadcast %9 : vector<1x256xf32> to vector<32x256xf32>
    %11 = arith.subf %5, %10 : vector<32x256xf32>
    %12 = arith.mulf %11, %11 : vector<32x256xf32>
    %cst_7 = arith.constant dense<0.000000e+00> : vector<256xf32>
    %13 = vector.multi_reduction <add>, %12, %cst_7 [0] : vector<32x256xf32> to vector<256xf32>
    %14 = vector.shape_cast %13 : vector<256xf32> to vector<1x256xf32>
    %cst_8 = arith.constant 3.125000e-02 : f32
    %15 = vector.broadcast %cst_8 : f32 to vector<1x256xf32>
    %16 = arith.mulf %14, %15 : vector<1x256xf32>
    %cst_9 = arith.constant 9.99999974E-6 : f32
    %17 = vector.broadcast %cst_9 : f32 to vector<1x256xf32>
    %18 = arith.addf %16, %17 : vector<1x256xf32>
    %19 = math.rsqrt %18 : vector<1x256xf32>
    %20 = vector.broadcast %19 : vector<1x256xf32> to vector<32x256xf32>
    %21 = arith.mulf %11, %20 : vector<32x256xf32>
    %c0_10 = arith.constant 0 : index
    %c0_11 = arith.constant 0 : index
    %22 = vector.load %arg4[%c0_10, %c0_11] : memref<32x1xf32, #tpu.memory_space<vmem>>, vector<32x1xf32>
    %23 = vector.broadcast %22 : vector<32x1xf32> to vector<32x256xf32>
    %24 = arith.mulf %21, %23 : vector<32x256xf32>
    %c0_12 = arith.constant 0 : index
    %c0_13 = arith.constant 0 : index
    %25 = vector.load %arg5[%c0_12, %c0_13] : memref<32x1xf32, #tpu.memory_space<vmem>>, vector<32x1xf32>
    %26 = vector.broadcast %25 : vector<32x1xf32> to vector<32x256xf32>
    %27 = arith.addf %24, %26 : vector<32x256xf32>
    %28 = math.tanh %27 : vector<32x256xf32>
    %c0_14 = arith.constant 0 : index
    %c0_15 = arith.constant 0 : index
    %29 = vector.load %arg6[%c0_14, %c0_15] : memref<32x32xf32, #tpu.memory_space<vmem>>, vector<32x32xf32>
    %cst_16 = arith.constant dense<0.000000e+00> : vector<32x256xf32>
    %30 = tpu.matmul %29, %28, %cst_16 {dimension_numbers = #tpu.dot_dimension_numbers<[1], [0], [0], [1], [0, 0, 1, 1], [], []>} : vector<32x32xf32>, vector<32x256xf32>, vector<32x256xf32> -> vector<32x256xf32>
    %c0_17 = arith.constant 0 : index
    %c0_18 = arith.constant 0 : index
    %31 = vector.load %arg7[%c0_17, %c0_18] : memref<32x1xf32, #tpu.memory_space<vmem>>, vector<32x1xf32>
    %32 = vector.broadcast %31 : vector<32x1xf32> to vector<32x256xf32>
    %33 = arith.addf %30, %32 : vector<32x256xf32>
    %cst_19 = arith.constant dense<0.000000e+00> : vector<256xf32>
    %34 = vector.multi_reduction <add>, %33, %cst_19 [0] : vector<32x256xf32> to vector<256xf32>
    %35 = vector.shape_cast %34 : vector<256xf32> to vector<1x256xf32>
    %cst_20 = arith.constant 3.125000e-02 : f32
    %36 = vector.broadcast %cst_20 : f32 to vector<1x256xf32>
    %37 = arith.mulf %35, %36 : vector<1x256xf32>
    %38 = vector.broadcast %37 : vector<1x256xf32> to vector<32x256xf32>
    %39 = arith.subf %33, %38 : vector<32x256xf32>
    %40 = arith.mulf %39, %39 : vector<32x256xf32>
    %cst_21 = arith.constant dense<0.000000e+00> : vector<256xf32>
    %41 = vector.multi_reduction <add>, %40, %cst_21 [0] : vector<32x256xf32> to vector<256xf32>
    %42 = vector.shape_cast %41 : vector<256xf32> to vector<1x256xf32>
    %cst_22 = arith.constant 3.125000e-02 : f32
    %43 = vector.broadcast %cst_22 : f32 to vector<1x256xf32>
    %44 = arith.mulf %42, %43 : vector<1x256xf32>
    %cst_23 = arith.constant 9.99999974E-6 : f32
    %45 = vector.broadcast %cst_23 : f32 to vector<1x256xf32>
    %46 = arith.addf %44, %45 : vector<1x256xf32>
    %47 = math.rsqrt %46 : vector<1x256xf32>
    %48 = vector.broadcast %47 : vector<1x256xf32> to vector<32x256xf32>
    %49 = arith.mulf %39, %48 : vector<32x256xf32>
    %c0_24 = arith.constant 0 : index
    %c0_25 = arith.constant 0 : index
    %50 = vector.load %arg8[%c0_24, %c0_25] : memref<32x1xf32, #tpu.memory_space<vmem>>, vector<32x1xf32>
    %51 = vector.broadcast %50 : vector<32x1xf32> to vector<32x256xf32>
    %52 = arith.mulf %49, %51 : vector<32x256xf32>
    %c0_26 = arith.constant 0 : index
    %c0_27 = arith.constant 0 : index
    %53 = vector.load %arg9[%c0_26, %c0_27] : memref<32x1xf32, #tpu.memory_space<vmem>>, vector<32x1xf32>
    %54 = vector.broadcast %53 : vector<32x1xf32> to vector<32x256xf32>
    %55 = arith.addf %52, %54 : vector<32x256xf32>
    %56 = math.tanh %55 : vector<32x256xf32>
    %c0_28 = arith.constant 0 : index
    %c0_29 = arith.constant 0 : index
    %57 = vector.load %arg10[%c0_28, %c0_29] : memref<16x32xf32, #tpu.memory_space<vmem>>, vector<16x32xf32>
    %cst_30 = arith.constant dense<0.000000e+00> : vector<16x256xf32>
    %58 = tpu.matmul %57, %56, %cst_30 {dimension_numbers = #tpu.dot_dimension_numbers<[1], [0], [0], [1], [0, 0, 1, 1], [], []>} : vector<16x32xf32>, vector<32x256xf32>, vector<16x256xf32> -> vector<16x256xf32>
    %c0_31 = arith.constant 0 : index
    %c0_32 = arith.constant 0 : index
    %59 = vector.load %arg11[%c0_31, %c0_32] : memref<16x1xf32, #tpu.memory_space<vmem>>, vector<16x1xf32>
    %60 = vector.broadcast %59 : vector<16x1xf32> to vector<16x256xf32>
    %61 = arith.addf %58, %60 : vector<16x256xf32>
    %c0_33 = arith.constant 0 : index
    %c0_34 = arith.constant 0 : index
    %62 = vector.load %arg12[%c0_33, %c0_34] : memref<16x256xf32, #tpu.memory_space<vmem>>, vector<16x256xf32>
    tpu.vector_store %arg12[%c0_33, %c0_34], %61 {strides = array<i32>} : memref<16x256xf32, #tpu.memory_space<vmem>>, vector<16x256xf32>,
    return
  }
  func.func @transform_0(%arg0: i32) -> (i32, i32) {
    %c0_i32 = arith.constant 0 : i32
    %c0_i32_0 = arith.constant 0 : i32
    return %c0_i32, %arg0 : i32, i32
  }
  func.func @transform_1(%arg0: i32) -> (i32, i32) {
    %c0_i32 = arith.constant 0 : i32
    %c0_i32_0 = arith.constant 0 : i32
    %c0_i32_1 = arith.constant 0 : i32
    return %c0_i32, %c0_i32_0 : i32, i32
  }
  func.func @transform_2(%arg0: i32) -> (i32, i32) {
    %c0_i32 = arith.constant 0 : i32
    %c0_i32_0 = arith.constant 0 : i32
    %c0_i32_1 = arith.constant 0 : i32
    return %c0_i32, %c0_i32_0 : i32, i32
  }
  func.func @transform_3(%arg0: i32) -> (i32, i32) {
    %c0_i32 = arith.constant 0 : i32
    %c0_i32_0 = arith.constant 0 : i32
    %c0_i32_1 = arith.constant 0 : i32
    return %c0_i32, %c0_i32_0 : i32, i32
  }
  func.func @transform_4(%arg0: i32) -> (i32, i32) {
    %c0_i32 = arith.constant 0 : i32
    %c0_i32_0 = arith.constant 0 : i32
    %c0_i32_1 = arith.constant 0 : i32
    return %c0_i32, %c0_i32_0 : i32, i32
  }
  func.func @transform_5(%arg0: i32) -> (i32, i32) {
    %c0_i32 = arith.constant 0 : i32
    %c0_i32_0 = arith.constant 0 : i32
    %c0_i32_1 = arith.constant 0 : i32
    return %c0_i32, %c0_i32_0 : i32, i32
  }
  func.func @transform_6(%arg0: i32) -> (i32, i32) {
    %c0_i32 = arith.constant 0 : i32
    %c0_i32_0 = arith.constant 0 : i32
    %c0_i32_1 = arith.constant 0 : i32
    return %c0_i32, %c0_i32_0 : i32, i32
  }
  func.func @transform_7(%arg0: i32) -> (i32, i32) {
    %c0_i32 = arith.constant 0 : i32
    %c0_i32_0 = arith.constant 0 : i32
    %c0_i32_1 = arith.constant 0 : i32
    return %c0_i32, %c0_i32_0 : i32, i32
  }
  func.func @transform_8(%arg0: i32) -> (i32, i32) {
    %c0_i32 = arith.constant 0 : i32
    %c0_i32_0 = arith.constant 0 : i32
    %c0_i32_1 = arith.constant 0 : i32
    return %c0_i32, %c0_i32_0 : i32, i32
  }
  func.func @transform_9(%arg0: i32) -> (i32, i32) {
    %c0_i32 = arith.constant 0 : i32
    %c0_i32_0 = arith.constant 0 : i32
    %c0_i32_1 = arith.constant 0 : i32
    return %c0_i32, %c0_i32_0 : i32, i32
  }
  func.func @transform_10(%arg0: i32) -> (i32, i32) {
    %c0_i32 = arith.constant 0 : i32
    %c0_i32_0 = arith.constant 0 : i32
    %c0_i32_1 = arith.constant 0 : i32
    return %c0_i32, %c0_i32_0 : i32, i32
  }
  func.func @transform_11(%arg0: i32) -> (i32, i32) {
    %c0_i32 = arith.constant 0 : i32
    %c0_i32_0 = arith.constant 0 : i32
    return %c0_i32, %arg0 : i32, i32
  }
}

</mosaic_0001>

<bundles_post_ra>
// kernel: ode_function_forward_T.1
= control target key start
LH: loop header
LB: loop body
LE: loop exit
PB: predicated region body
PF: predicated region fallthrough
CT: control target
= control target key end

     0   :  { %v746_v3 = vmov 0   ;;  %vm71_vm0 = vcmask 130048   ;;  %s1013_s0 = inlined_call_operand.vmem [shape: f32[16,256], index: 0, kind: input, shape index: {}]   ;;  %s1014_s1 = inlined_call_operand.vmem [shape: f32[32,16], index: 1, kind: input, shape index: {}]   ;;  %s1015_s2 = inlined_call_operand.vmem [shape: f32[32,1], index: 2, kind: input, shape index: {}]   ;;  %s1016_s3 = inlined_call_operand.vmem [shape: f32[32,1], index: 3, kind: input, shape index: {}]   ;;  %s1017_s4 = inlined_call_operand.vmem [shape: f32[32,1], index: 4, kind: input, shape index: {}]   ;;  %s1018_s5 = inlined_call_operand.vmem [shape: f32[32,32], index: 5, kind: input, shape index: {}]   ;;  %s1019_s6 = inlined_call_operand.vmem [shape: f32[32,1], index: 6, kind: input, shape index: {}]   ;;  %s1020_s7 = inlined_call_operand.vmem [shape: f32[32,1], index: 7, kind: input, shape index: {}]   ;;  %s1021_s8 = inlined_call_operand.vmem [shape: f32[32,1], index: 8, kind: input, shape index: {}]   ;;  %s1022_s9 = inlined_call_operand.vmem [shape: f32[16,32], index: 9, kind: input, shape index: {}]   ;;  %s1023_s10 = inlined_call_operand.vmem [shape: f32[16,1], index: 10, kind: input, shape index: {}]   ;;  %s1024_s11 = inlined_call_operand.hbm [shape: f32[16,256], index: 11, kind: output, shape index: {}]  }
   0x1   :  { %v41_v0 = vld [vmem:[%s1013_s0 + $0x10] sm:$0xff]  ;;  %v42_v1 = vld [vmem:[%s1013_s0 + $0x18] sm:$0xff]  ;;  %678 = vset.pattern.permute.xlu1 %v746_v3  ;;  %677 = vset.pattern.permute.xlu0 %v746_v3  ;;  %v47_v4 = vld [vmem:[%s1015_s2] sm:$0xff] }
   0x2   :  { %v49_v2 = vld [vmem:[%s1015_s2 + $0x10] sm:$0xff]  ;;  %v39_v5 = vld [vmem:[%s1013_s0] sm:$0xff]  ;;  %v40_v6 = vld [vmem:[%s1013_s0 + $0x8] sm:$0xff]  ;;  %98 = vmatpush.msra.mxu0 %v41_v0  ;;  %127 = vmatpush.msra.mxu1 %v42_v1 }
   0x3   :  { %v43_v7 = vld [vmem:[%s1014_s1] sm:$0xff]  ;;  %63 = vperm.xlu1 %678, %v49_v2   ;;  %53 = vperm.xlu0 %677, %v47_v4  }
   0x4   :  { %99 = vmatpush.msra.mxu0 %v39_v5  ;;  %128 = vmatpush.msra.mxu1 %v40_v6 }
   0x5   :  { %645 = vmatmul.msk.f32.vlgmr.msra.gmra.mxu0 %vm71_vm0, %v43_v7  ;;  %649 = vmatmul.msk.f32.vlgmr.msra.gmra.mxu1 %vm71_vm0, %v43_v7 }
   0x6   :  { %679 = vset.pattern.permute.xlu2 %v746_v3 }
   0x7   :  { %16 = vsyncpa [#allocation3], 0  ;;  %v50_v8 = vld [vmem:[%s1015_s2 + $0x18] sm:$0xff]  ;;  %v48_v9 = vld [vmem:[%s1015_s2 + $0x8] sm:$0xff]  ;;  %vm328_vm7 = vcmask 261120   ;;  %s633_s27 = sshll.u32 %s1024_s11, 4  ;;  %s634_s27 = int_to_ptr.hbm [resolvable:$true] %s633_s27 }
   0x8   :  { %v44_v10 = vld [vmem:[%s1014_s1 + $0x8] sm:$0xff]  ;;  %v263_v12 = vld [vmem:[%s1017_s4 + $0x18] sm:$0xff]  ;;  %v45_v13 = vld [vmem:[%s1014_s1 + $0x10] sm:$0xff]  ;;  %s749_s28 = smov 16  }
   0x9   :  { %v229_v11 = vld [vmem:[%s1016_s3 + $0x8] sm:$0xff]  ;;  %v231_v14 = vld [vmem:[%s1016_s3 + $0x18] sm:$0xff]  ;;  %v228_v16 = vld [vmem:[%s1016_s3] sm:$0xff] }
   0xa   :  { %249 = vperm.xlu2 %679, %v231_v14   ;;  %v261_v15 = vld [vmem:[%s1017_s4 + $0x8] sm:$0xff]  ;;  %v46_v17 = vld [vmem:[%s1014_s1 + $0x18] sm:$0xff]  ;;  %v230_v18 = vld [vmem:[%s1016_s3 + $0x10] sm:$0xff] }
   0xb   :  { %68 = vperm.xlu1 %678, %v50_v8   ;;  %58 = vperm.xlu0 %677, %v48_v9   ;;  %v305_v19 = vld [vmem:[%s1019_s6 + $0x8] sm:$0xff]  ;;  %v304_v20 = vld [vmem:[%s1019_s6] sm:$0xff]  ;;  %v262_v21 = vld [vmem:[%s1017_s4 + $0x10] sm:$0xff] }
   0xc   :  { %v488_v22 = vld [vmem:[%s1020_s7 + $0x18] sm:$0xff]  ;;  %v260_v24 = vld [vmem:[%s1017_s4] sm:$0xff]  ;;  %v486_v25 = vld [vmem:[%s1020_s7 + $0x8] sm:$0xff]  ;;  %s748_s4 = smov 256  }
   0xd   :  { %646 = vmatmul.msk.f32.gmra.mxu0 %vm71_vm0, %v44_v10  ;;  %650 = vmatmul.msk.f32.gmra.mxu1 %vm71_vm0, %v44_v10  ;;  %v307_v23 = vld [vmem:[%s1019_s6 + $0x18] sm:$0xff]  ;;  %v306_v27 = vld [vmem:[%s1019_s6 + $0x10] sm:$0xff]  ;;  %v518_v28 = vld [vmem:[%s1021_s8 + $0x8] sm:$0xff] }
   0xe   :  { %v520_v26 = vld [vmem:[%s1021_s8 + $0x18] sm:$0xff]  ;;  %v485_v29 = vld [vmem:[%s1020_s7] sm:$0xff]  ;;  %v487_v30 = vld [vmem:[%s1020_s7 + $0x10] sm:$0xff] }
   0xf   :  { %v560_v31 = vld [vmem:[%s1023_s10 + $0x8] sm:$0xff]  ;;  %v559_v32 = vld [vmem:[%s1023_s10] sm:$0xff]  ;;  %v519_v33 = vld [vmem:[%s1021_s8 + $0x10] sm:$0xff] }
  0x10   :  { %v517_v34 = vld [vmem:[%s1021_s8] sm:$0xff] }
  0x12   :  { %244 = vperm.xlu2 %679, %v230_v18  }
  0x13   :  { %239 = vperm.xlu1 %678, %v229_v11   ;;  %281 = vperm.xlu0 %677, %v263_v12  }
  0x15   :  { %647 = vmatmul.msk.f32.gmra.mxu0 %vm71_vm0, %v45_v13  ;;  %651 = vmatmul.msk.f32.gmra.mxu1 %vm71_vm0, %v45_v13 }
  0x1a   :  { %276 = vperm.xlu2 %679, %v262_v21  }
  0x1b   :  { %271 = vperm.xlu1 %678, %v261_v15   ;;  %234 = vperm.xlu0 %677, %v228_v16  }
  0x1d   :  { %648 = vmatmul.msk.f32.gmra.mxu0 %vm71_vm0, %v46_v17  ;;  %652 = vmatmul.msk.f32.gmra.mxu1 %vm71_vm0, %v46_v17 }
  0x22   :  { %266 = vperm.xlu2 %679, %v260_v24  }
  0x23   :  { %315 = vperm.xlu1 %678, %v305_v19   ;;  %310 = vperm.xlu0 %677, %v304_v20  }
  0x2a   :  { %320 = vperm.xlu2 %679, %v306_v27  }
  0x2b   :  { %506 = vperm.xlu1 %678, %v488_v22   ;;  %325 = vperm.xlu0 %677, %v307_v23  }
  0x32   :  { %501 = vperm.xlu2 %679, %v487_v30  }
  0x33   :  { %496 = vperm.xlu1 %678, %v486_v25   ;;  %538 = vperm.xlu0 %677, %v520_v26  }
  0x3a   :  { %533 = vperm.xlu2 %679, %v519_v33  }
  0x3b   :  { %528 = vperm.xlu1 %678, %v518_v28   ;;  %491 = vperm.xlu0 %677, %v485_v29  }
  0x42   :  { %523 = vperm.xlu2 %679, %v517_v34  }
  0x43   :  { %568 = vperm.xlu1 %678, %v560_v31   ;;  %563 = vperm.xlu0 %677, %v559_v32  }
  0x75   :  { %v54_v37 = vpop.permute.xlu0 %53  ;;  %v64_v40 = vpop.permute.xlu1 %63 }
  0x7d   :  { %v59_v43 = vpop.permute.xlu0 %58  ;;  %v69_v50 = vpop.permute.xlu1 %68 }
  0x82   :  { %v101_v35 = vpop.f32.mrf.mxu0  ;;  %v130_v36 = vpop.f32.mrf.mxu1 }
  0x83   :  { %v102_v46 = vadd.f32 %v101_v35, %v54_v37  ;;  %v131_v47 = vadd.f32 %v130_v36, %v54_v37 }
  0x8a   :  { %v104_v38 = vpop.f32.mrf.mxu0  ;;  %v133_v39 = vpop.f32.mrf.mxu1 }
  0x8b   :  { %v105_v44 = vadd.f32 %v104_v38, %v59_v43  ;;  %v134_v45 = vadd.f32 %v133_v39, %v59_v43 }
  0x8d   :  { %v142_v51 = vadd.f32 %v105_v44, %v102_v46  ;;  %v151_v52 = vadd.f32 %v134_v45, %v131_v47 }
  0x92   :  { %v107_v41 = vpop.f32.mrf.mxu0  ;;  %v136_v42 = vpop.f32.mrf.mxu1 }
  0x93   :  { %v108_v48 = vadd.f32 %v107_v41, %v64_v40  ;;  %v137_v49 = vadd.f32 %v136_v42, %v64_v40 }
  0x95   :  { %v143_v55 = vadd.f32 %v142_v51, %v108_v48  ;;  %v152_v56 = vadd.f32 %v151_v52, %v137_v49 }
  0x9a   :  { %v110_v53 = vpop.f32.mrf.mxu0  ;;  %v139_v54 = vpop.f32.mrf.mxu1 }
  0x9b   :  { %v111_v57 = vadd.f32 %v110_v53, %v69_v50  ;;  %v140_v58 = vadd.f32 %v139_v54, %v69_v50 }
  0x9d   :  { %v144_v59 = vadd.f32 %v143_v55, %v111_v57  ;;  %v153_v60 = vadd.f32 %v152_v56, %v140_v58 }
  0x9f   :  { %v145_v61 = vrot.slane %v144_v59, 4  ;;  %v154_v62 = vrot.slane %v153_v60, 4 }
  0xa1   :  { %v146_v63 = vadd.f32 %v145_v61, %v144_v59  ;;  %v155_v0 = vadd.f32 %v154_v62, %v153_v60  ;;  %v282_v61 = vpop.permute.xlu0 %281 }
  0xa3   :  { %v147_v1 = vrot.slane %v146_v63, 2  ;;  %v156_v2 = vrot.slane %v155_v0, 2 }
  0xa5   :  { %v148_v3 = vadd.f32 %v147_v1, %v146_v63  ;;  %v157_v4 = vadd.f32 %v156_v2, %v155_v0  ;;  %v240_v0 = vpop.permute.xlu1 %239 }
  0xa7   :  { %v149_v5 = vrot.slane %v148_v3, 1  ;;  %v158_v6 = vrot.slane %v157_v4, 1 }
  0xa9   :  { %v150_v7 = vadd.f32 %v149_v5, %v148_v3  ;;  %v159_v8 = vadd.f32 %v158_v6, %v157_v4 }
  0xab   :  { %v160_v9 = vmul.f32 0.03125, %v150_v7  ;;  %v161_v10 = vmul.f32 0.03125, %v159_v8 }
  0xad   :  { %v920_v11 = vsub.f32 %v102_v46, %v160_v9  ;;  %v922_v12 = vsub.f32 %v105_v44, %v160_v9  ;;  %v924_v13 = vsub.f32 %v108_v48, %v160_v9  ;;  %v926_v14 = vsub.f32 %v131_v47, %v161_v10  ;;  %v250_v48 = vpop.permute.xlu2 %249 }
  0xae   :  { %v928_v15 = vsub.f32 %v134_v45, %v161_v10  ;;  %v930_v16 = vsub.f32 %v137_v49, %v161_v10  ;;  %v168_v17 = vsub.f32 %v111_v57, %v160_v9  ;;  %v169_v20 = vsub.f32 %v140_v58, %v161_v10 }
  0xaf   :  { %v170_v18 = vmul.f32 %v920_v11, %v920_v11  ;;  %v172_v19 = vmul.f32 %v922_v12, %v922_v12  ;;  %v171_v21 = vmul.f32 %v926_v14, %v926_v14  ;;  %v174_v23 = vmul.f32 %v924_v13, %v924_v13 }
  0xb0   :  { %v173_v22 = vmul.f32 %v928_v15, %v928_v15  ;;  %v175_v25 = vmul.f32 %v930_v16, %v930_v16  ;;  %v176_v27 = vmul.f32 %v168_v17, %v168_v17  ;;  %v177_v29 = vmul.f32 %v169_v20, %v169_v20 }
  0xb1   :  { %v178_v24 = vadd.f32 %v172_v19, %v170_v18 }
  0xb2   :  { %v187_v26 = vadd.f32 %v173_v22, %v171_v21 }
  0xb3   :  { %v179_v28 = vadd.f32 %v178_v24, %v174_v23 }
  0xb4   :  { %v188_v30 = vadd.f32 %v187_v26, %v175_v25  ;;  %v235_v25 = vpop.permute.xlu0 %234 }
  0xb5   :  { %v180_v31 = vadd.f32 %v179_v28, %v176_v27  ;;  %v245_v54 = vpop.permute.xlu2 %244 }
  0xb6   :  { %v189_v32 = vadd.f32 %v188_v30, %v177_v29 }
  0xb7   :  { %v181_v33 = vrot.slane %v180_v31, 4 }
  0xb8   :  { %v190_v34 = vrot.slane %v189_v32, 4 }
  0xb9   :  { %v182_v35 = vadd.f32 %v181_v33, %v180_v31 }
  0xba   :  { %v191_v36 = vadd.f32 %v190_v34, %v189_v32 }
  0xbb   :  { %v183_v37 = vrot.slane %v182_v35, 2 }
  0xbc   :  { %v192_v38 = vrot.slane %v191_v36, 2 }
  0xbd   :  { %v184_v39 = vadd.f32 %v183_v37, %v182_v35  ;;  %v277_v6 = vpop.permute.xlu2 %276  ;;  %v300_v37 = vld [vmem:[%s1018_s5] sm:$0xff] }
  0xbe   :  { %v193_v40 = vadd.f32 %v192_v38, %v191_v36 }
  0xbf   :  { %v185_v41 = vrot.slane %v184_v39, 1 }
  0xc0   :  { %v194_v42 = vrot.slane %v193_v40, 1 }
  0xc1   :  { %v186_v43 = vadd.f32 %v185_v41, %v184_v39  ;;  %v302_v41 = vld [vmem:[%s1018_s5 + $0x10] sm:$0xff] }
  0xc2   :  { %v195_v44 = vadd.f32 %v194_v42, %v193_v40  ;;  %v301_v40 = vld [vmem:[%s1018_s5 + $0x8] sm:$0xff]  ;;  %v303_v42 = vld [vmem:[%s1018_s5 + $0x18] sm:$0xff] }
  0xc3   :  { %v196_v45 = vmul.f32 0.03125, %v186_v43 }
  0xc4   :  { %v197_v46 = vmul.f32 0.03125, %v195_v44 }
  0xc5   :  { %v198_v47 = vadd.f32 1e-05, %v196_v45  ;;  %v267_v30 = vpop.permute.xlu2 %266 }
  0xc6   :  { %v199_v49 = vadd.f32 1e-05, %v197_v46 }
  0xc7   :  { %680 = vrsqrt.f32 %v198_v47  ;;  %vm206_vm3 = vweird.f32 %v198_v47 }
  0xc8   :  { %682 = vrsqrt.f32 %v199_v49  ;;  %vm216_vm5 = vweird.f32 %v199_v49 }
  0xcd   :  { %v681_v50 = vpop.eup %680 }
  0xce   :  { %v683_v51 = vpop.eup %682  ;;  %v201_v52 = vmul.f32 %v681_v50, %v198_v47  ;;  %vm207_vm1 = vweird.f32 %v681_v50  ;;  %v311_v47 = vpop.permute.xlu0 %310 }
  0xcf   :  { %v211_v53 = vmul.f32 %v683_v51, %v199_v49  ;;  %vm217_vm2 = vweird.f32 %v683_v51  ;;  %vm208_vm4 = vmor %vm206_vm3, %vm207_vm1 }
  0xd0   :  { %v202_v55 = vmul.f32 %v681_v50, %v201_v52  ;;  %vm218_vm6 = vmor %vm216_vm5, %vm217_vm2  ;;  %v321_v52 = vpop.permute.xlu2 %320 }
  0xd1   :  { %v212_v56 = vmul.f32 %v683_v51, %v211_v53 }
  0xd2   :  { %v203_v57 = vmul.f32 0.5, %v202_v55 }
  0xd3   :  { %v213_v58 = vmul.f32 0.5, %v212_v56 }
  0xd4   :  { %v204_v59 = vsub.f32 1.5, %v203_v57 }
  0xd5   :  { %v214_v60 = vsub.f32 1.5, %v213_v58 }
  0xd6   :  { %v205_v62 = vmul.f32 %v681_v50, %v204_v59  ;;  %v326_v59 = vpop.permute.xlu0 %325 }
  0xd7   :  { %v215_v63 = vmul.f32 %v683_v51, %v214_v60 }
  0xd8   :  { %v209_v1 = vsel %vm208_vm4, %v681_v50, %v205_v62 }
  0xd9   :  { %v226_v2 = vmul.f32 %v209_v1, %v168_v17  ;;  %v219_v3 = vsel %vm218_vm6, %v683_v51, %v215_v63  ;;  %v224_v4 = vmul.f32 %v209_v1, %v924_v13  ;;  %v222_v9 = vmul.f32 %v209_v1, %v922_v12 }
  0xda   :  { %v227_v5 = vmul.f32 %v219_v3, %v169_v20  ;;  %v225_v7 = vmul.f32 %v219_v3, %v930_v16  ;;  %v223_v18 = vmul.f32 %v219_v3, %v928_v15  ;;  %v220_v21 = vmul.f32 %v209_v1, %v920_v11  ;;  %v272_v16 = vpop.permute.xlu1 %271 }
  0xdb   :  { %v258_v8 = vmul.f32 %v250_v48, %v226_v2  ;;  %v256_v19 = vmul.f32 %v245_v54, %v224_v4  ;;  %v221_v23 = vmul.f32 %v219_v3, %v926_v14  ;;  %v254_v24 = vmul.f32 %v240_v0, %v222_v9 }
  0xdc   :  { %v259_v10 = vmul.f32 %v250_v48, %v227_v5  ;;  %v257_v22 = vmul.f32 %v245_v54, %v225_v7  ;;  %v255_v20 = vmul.f32 %v240_v0, %v223_v18  ;;  %v252_v27 = vmul.f32 %v235_v25, %v220_v21 }
  0xdd   :  { %v290_v17 = vadd.f32 %v282_v61, %v258_v8  ;;  %v288_v26 = vadd.f32 %v277_v6, %v256_v19  ;;  %v253_v29 = vmul.f32 %v235_v25, %v221_v23  ;;  %v286_v12 = vadd.f32 %v272_v16, %v254_v24 }
  0xde   :  { %v291_v13 = vadd.f32 %v282_v61, %v259_v10  ;;  %v289_v28 = vadd.f32 %v277_v6, %v257_v22  ;;  %v287_v15 = vadd.f32 %v272_v16, %v255_v20  ;;  %v284_v11 = vadd.f32 %v267_v30, %v252_v27 }
  0xdf   :  { %684 = vtanh.f32 %v290_v17  ;;  %v285_v31 = vadd.f32 %v267_v30, %v253_v29 }
  0xe0   :  { %686 = vtanh.f32 %v291_v13 }
  0xe1   :  { %688 = vtanh.f32 %v288_v26 }
  0xe2   :  { %690 = vtanh.f32 %v289_v28  ;;  %v316_v50 = vpop.permute.xlu1 %315 }
  0xe3   :  { %692 = vtanh.f32 %v286_v12 }
  0xe4   :  { %694 = vtanh.f32 %v287_v15 }
  0xe5   :  { %v685_v14 = vpop.eup %684  ;;  %696 = vtanh.f32 %v284_v11 }
  0xe6   :  { %v687_v32 = vpop.eup %686  ;;  %698 = vtanh.f32 %v285_v31  ;;  %353 = vmatpush.msra.mxu2 %v685_v14 }
  0xe7   :  { %v689_v33 = vpop.eup %688  ;;  %382 = vmatpush.msra.mxu3 %v687_v32 }
  0xe8   :  { %v691_v34 = vpop.eup %690  ;;  %354 = vmatpush.msra.mxu2 %v689_v33 }
  0xe9   :  { %v693_v35 = vpop.eup %692  ;;  %383 = vmatpush.msra.mxu3 %v691_v34 }
  0xea   :  { %v695_v36 = vpop.eup %694  ;;  %355 = vmatpush.msra.mxu2 %v693_v35 }
  0xeb   :  { %v697_v38 = vpop.eup %696  ;;  %384 = vmatpush.msra.mxu3 %v695_v36 }
  0xec   :  { %v699_v39 = vpop.eup %698  ;;  %356 = vmatpush.msra.mxu2 %v697_v38 }
  0xed   :  { %385 = vmatpush.msra.mxu3 %v699_v39  ;;  %653 = vmatmul.msk.f32.vlgmr.msra.gmra.mxu2 %vm328_vm7, %v300_v37 }
  0xee   :  { %657 = vmatmul.msk.f32.vlgmr.msra.gmra.mxu3 %vm328_vm7, %v300_v37 }
  0xf5   :  { %654 = vmatmul.msk.f32.gmra.mxu2 %vm328_vm7, %v301_v40 }
  0xf6   :  { %658 = vmatmul.msk.f32.gmra.mxu3 %vm328_vm7, %v301_v40 }
  0xfd   :  { %655 = vmatmul.msk.f32.gmra.mxu2 %vm328_vm7, %v302_v41 }
  0xfe   :  { %659 = vmatmul.msk.f32.gmra.mxu3 %vm328_vm7, %v302_v41 }
 0x105   :  { %656 = vmatmul.msk.f32.gmra.mxu2 %vm328_vm7, %v303_v42 }
 0x106   :  { %660 = vmatmul.msk.f32.gmra.mxu3 %vm328_vm7, %v303_v42 }
 0x170   :  { %v358_v43 = vpop.f32.mrf.mxu2 }
 0x171   :  { %v387_v44 = vpop.f32.mrf.mxu3  ;;  %v359_v54 = vadd.f32 %v358_v43, %v311_v47 }
 0x172   :  { %v388_v56 = vadd.f32 %v387_v44, %v311_v47 }
 0x178   :  { %v361_v45 = vpop.f32.mrf.mxu2 }
 0x179   :  { %v390_v46 = vpop.f32.mrf.mxu3  ;;  %v362_v51 = vadd.f32 %v361_v45, %v316_v50 }
 0x17a   :  { %v391_v53 = vadd.f32 %v390_v46, %v316_v50 }
 0x17b   :  { %v399_v58 = vadd.f32 %v362_v51, %v359_v54 }
 0x17c   :  { %v408_v60 = vadd.f32 %v391_v53, %v388_v56 }
 0x180   :  { %v364_v48 = vpop.f32.mrf.mxu2 }
 0x181   :  { %v393_v49 = vpop.f32.mrf.mxu3  ;;  %v365_v55 = vadd.f32 %v364_v48, %v321_v52 }
 0x182   :  { %v394_v57 = vadd.f32 %v393_v49, %v321_v52 }
 0x183   :  { %v400_v62 = vadd.f32 %v399_v58, %v365_v55  ;;  %v502_v58 = vpop.permute.xlu2 %501 }
 0x184   :  { %v409_v1 = vadd.f32 %v408_v60, %v394_v57 }
 0x188   :  { %v367_v61 = vpop.f32.mrf.mxu2 }
 0x189   :  { %v368_v63 = vadd.f32 %v367_v61, %v326_v59  ;;  %v396_v0 = vpop.f32.mrf.mxu3 }
 0x18a   :  { %v397_v2 = vadd.f32 %v396_v0, %v326_v59 }
 0x18b   :  { %v401_v3 = vadd.f32 %v400_v62, %v368_v63 }
 0x18c   :  { %v410_v4 = vadd.f32 %v409_v1, %v397_v2  ;;  %v539_v1 = vpop.permute.xlu0 %538 }
 0x18d   :  { %v402_v5 = vrot.slane %v401_v3, 4 }
 0x18e   :  { %v411_v6 = vrot.slane %v410_v4, 4 }
 0x18f   :  { %v403_v7 = vadd.f32 %v402_v5, %v401_v3 }
 0x190   :  { %v412_v8 = vadd.f32 %v411_v6, %v410_v4 }
 0x191   :  { %v404_v9 = vrot.slane %v403_v7, 2 }
 0x192   :  { %v413_v10 = vrot.slane %v412_v8, 2 }
 0x193   :  { %v405_v18 = vadd.f32 %v404_v9, %v403_v7  ;;  %v534_v7 = vpop.permute.xlu2 %533 }
 0x194   :  { %v414_v19 = vadd.f32 %v413_v10, %v412_v8 }
 0x195   :  { %v406_v21 = vrot.slane %v405_v18, 1 }
 0x196   :  { %v415_v22 = vrot.slane %v414_v19, 1 }
 0x197   :  { %v407_v23 = vadd.f32 %v406_v21, %v405_v18 }
 0x198   :  { %v416_v17 = vadd.f32 %v415_v22, %v414_v19 }
 0x199   :  { %v417_v24 = vmul.f32 0.03125, %v407_v23 }
 0x19a   :  { %v418_v25 = vmul.f32 0.03125, %v416_v17 }
 0x19b   :  { %v970_v13 = vsub.f32 %v359_v54, %v417_v24  ;;  %v972_v20 = vsub.f32 %v362_v51, %v417_v24  ;;  %v974_v26 = vsub.f32 %v365_v55, %v417_v24  ;;  %v425_v29 = vsub.f32 %v368_v63, %v417_v24 }
 0x19c   :  { %v976_v27 = vsub.f32 %v388_v56, %v418_v25  ;;  %v978_v16 = vsub.f32 %v391_v53, %v418_v25  ;;  %v980_v28 = vsub.f32 %v394_v57, %v418_v25  ;;  %v426_v15 = vsub.f32 %v397_v2, %v418_v25  ;;  %v507_v57 = vpop.permute.xlu1 %506 }
 0x19d   :  { %v427_v12 = vmul.f32 %v970_v13, %v970_v13  ;;  %v429_v30 = vmul.f32 %v972_v20, %v972_v20  ;;  %v431_v14 = vmul.f32 %v974_v26, %v974_v26  ;;  %v433_v35 = vmul.f32 %v425_v29, %v425_v29 }
 0x19e   :  { %v428_v11 = vmul.f32 %v976_v27, %v976_v27  ;;  %v430_v31 = vmul.f32 %v978_v16, %v978_v16  ;;  %v432_v33 = vmul.f32 %v980_v28, %v980_v28  ;;  %v434_v37 = vmul.f32 %v426_v15, %v426_v15 }
 0x19f   :  { %v435_v32 = vadd.f32 %v429_v30, %v427_v12 }
 0x1a0   :  { %v444_v34 = vadd.f32 %v430_v31, %v428_v11 }
 0x1a1   :  { %v436_v36 = vadd.f32 %v435_v32, %v431_v14  ;;  %v492_v14 = vpop.permute.xlu0 %491 }
 0x1a2   :  { %v445_v38 = vadd.f32 %v444_v34, %v432_v33 }
 0x1a3   :  { %v437_v39 = vadd.f32 %v436_v36, %v433_v35 }
 0x1a4   :  { %v446_v40 = vadd.f32 %v445_v38, %v434_v37  ;;  %v497_v4 = vpop.permute.xlu1 %496  ;;  %v524_v37 = vpop.permute.xlu2 %523 }
 0x1a5   :  { %v438_v41 = vrot.slane %v437_v39, 4 }
 0x1a6   :  { %v447_v42 = vrot.slane %v446_v40, 4 }
 0x1a7   :  { %v439_v43 = vadd.f32 %v438_v41, %v437_v39 }
 0x1a8   :  { %v448_v44 = vadd.f32 %v447_v42, %v446_v40 }
 0x1a9   :  { %v440_v45 = vrot.slane %v439_v43, 2 }
 0x1aa   :  { %v449_v46 = vrot.slane %v448_v44, 2 }
 0x1ab   :  { %v441_v47 = vadd.f32 %v440_v45, %v439_v43 }
 0x1ac   :  { %v450_v48 = vadd.f32 %v449_v46, %v448_v44  ;;  %v557_v46 = vld [vmem:[%s1022_s9] sm:$0xff] }
 0x1ad   :  { %v442_v49 = vrot.slane %v441_v47, 1 }
 0x1ae   :  { %v451_v50 = vrot.slane %v450_v48, 1 }
 0x1af   :  { %v443_v51 = vadd.f32 %v442_v49, %v441_v47  ;;  %v558_v47 = vld [vmem:[%s1022_s9 + $0x8] sm:$0xff]  ;;  %v564_v49 = vpop.permute.xlu0 %563  ;;  %s747_s9 = smov [#allocation2]  }
 0x1b0   :  { %v452_v52 = vadd.f32 %v451_v50, %v450_v48  ;;  %s631_s24 = sshll.u32 %s747_s9, 4  ;;  %s632_s24 = int_to_ptr.vmem [resolvable:$true] %s631_s24 }
 0x1b1   :  { %v453_v53 = vmul.f32 0.03125, %v443_v51 }
 0x1b2   :  { %v454_v54 = vmul.f32 0.03125, %v452_v52 }
 0x1b3   :  { %v455_v55 = vadd.f32 1e-05, %v453_v53 }
 0x1b4   :  { %v456_v56 = vadd.f32 1e-05, %v454_v54 }
 0x1b5   :  { %700 = vrsqrt.f32 %v455_v55  ;;  %vm463_vm10 = vweird.f32 %v455_v55 }
 0x1b6   :  { %702 = vrsqrt.f32 %v456_v56  ;;  %vm473_vm12 = vweird.f32 %v456_v56 }
 0x1bb   :  { %v701_v59 = vpop.eup %700 }
 0x1bc   :  { %v703_v60 = vpop.eup %702  ;;  %v458_v61 = vmul.f32 %v701_v59, %v455_v55  ;;  %vm464_vm8 = vweird.f32 %v701_v59 }
 0x1bd   :  { %v468_v62 = vmul.f32 %v703_v60, %v456_v56  ;;  %vm474_vm9 = vweird.f32 %v703_v60  ;;  %vm465_vm11 = vmor %vm463_vm10, %vm464_vm8 }
 0x1be   :  { %v459_v63 = vmul.f32 %v701_v59, %v458_v61  ;;  %vm475_vm13 = vmor %vm473_vm12, %vm474_vm9 }
 0x1bf   :  { %v469_v0 = vmul.f32 %v703_v60, %v468_v62 }
 0x1c0   :  { %v460_v2 = vmul.f32 0.5, %v459_v63 }
 0x1c1   :  { %v470_v3 = vmul.f32 0.5, %v469_v0 }
 0x1c2   :  { %v461_v5 = vsub.f32 1.5, %v460_v2 }
 0x1c3   :  { %v471_v6 = vsub.f32 1.5, %v470_v3 }
 0x1c4   :  { %v462_v8 = vmul.f32 %v701_v59, %v461_v5 }
 0x1c5   :  { %v472_v9 = vmul.f32 %v703_v60, %v471_v6 }
 0x1c6   :  { %v466_v10 = vsel %vm465_vm11, %v701_v59, %v462_v8 }
 0x1c7   :  { %v483_v18 = vmul.f32 %v466_v10, %v425_v29  ;;  %v476_v19 = vsel %vm475_vm13, %v703_v60, %v472_v9  ;;  %v481_v21 = vmul.f32 %v466_v10, %v974_v26  ;;  %v479_v22 = vmul.f32 %v466_v10, %v972_v20  ;;  %v529_v20 = vpop.permute.xlu1 %528 }
 0x1c8   :  { %v484_v23 = vmul.f32 %v476_v19, %v426_v15  ;;  %v482_v17 = vmul.f32 %v476_v19, %v980_v28  ;;  %v480_v24 = vmul.f32 %v476_v19, %v978_v16  ;;  %v477_v25 = vmul.f32 %v466_v10, %v970_v13 }
 0x1c9   :  { %v515_v12 = vmul.f32 %v507_v57, %v483_v18  ;;  %v513_v30 = vmul.f32 %v502_v58, %v481_v21  ;;  %v511_v11 = vmul.f32 %v497_v4, %v479_v22  ;;  %v478_v31 = vmul.f32 %v476_v19, %v976_v27 }
 0x1ca   :  { %v516_v32 = vmul.f32 %v507_v57, %v484_v23  ;;  %v514_v29 = vmul.f32 %v502_v58, %v482_v17  ;;  %v512_v33 = vmul.f32 %v497_v4, %v480_v24  ;;  %v509_v35 = vmul.f32 %v492_v14, %v477_v25 }
 0x1cb   :  { %v547_v34 = vadd.f32 %v539_v1, %v515_v12  ;;  %v545_v26 = vadd.f32 %v534_v7, %v513_v30  ;;  %v510_v28 = vmul.f32 %v492_v14, %v478_v31  ;;  %v543_v16 = vadd.f32 %v529_v20, %v511_v11 }
 0x1cc   :  { %v548_v15 = vadd.f32 %v539_v1, %v516_v32  ;;  %v546_v36 = vadd.f32 %v534_v7, %v514_v29  ;;  %v544_v13 = vadd.f32 %v529_v20, %v512_v33  ;;  %v541_v38 = vadd.f32 %v524_v37, %v509_v35 }
 0x1cd   :  { %704 = vtanh.f32 %v547_v34  ;;  %v542_v27 = vadd.f32 %v524_v37, %v510_v28 }
 0x1ce   :  { %706 = vtanh.f32 %v548_v15 }
 0x1cf   :  { %708 = vtanh.f32 %v545_v26  ;;  %v569_v54 = vpop.permute.xlu1 %568 }
 0x1d0   :  { %710 = vtanh.f32 %v546_v36 }
 0x1d1   :  { %712 = vtanh.f32 %v543_v16 }
 0x1d2   :  { %714 = vtanh.f32 %v544_v13 }
 0x1d3   :  { %v705_v39 = vpop.eup %704  ;;  %716 = vtanh.f32 %v541_v38 }
 0x1d4   :  { %v707_v40 = vpop.eup %706  ;;  %589 = vmatpush.msrb.mxu0 %v705_v39  ;;  %665 = vmatpush.msrb.mxu2 %v705_v39  ;;  %718 = vtanh.f32 %v542_v27 }
 0x1d5   :  { %v709_v41 = vpop.eup %708  ;;  %612 = vmatpush.msrb.mxu1 %v707_v40  ;;  %669 = vmatpush.msrb.mxu3 %v707_v40 }
 0x1d6   :  { %v711_v42 = vpop.eup %710  ;;  %590 = vmatpush.msrb.mxu0 %v709_v41  ;;  %666 = vmatpush.msrb.mxu2 %v709_v41 }
 0x1d7   :  { %v713_v43 = vpop.eup %712  ;;  %613 = vmatpush.msrb.mxu1 %v711_v42  ;;  %670 = vmatpush.msrb.mxu3 %v711_v42 }
 0x1d8   :  { %v715_v44 = vpop.eup %714  ;;  %591 = vmatpush.msrb.mxu0 %v713_v43  ;;  %667 = vmatpush.msrb.mxu2 %v713_v43 }
 0x1d9   :  { %v717_v45 = vpop.eup %716  ;;  %614 = vmatpush.msrb.mxu1 %v715_v44  ;;  %671 = vmatpush.msrb.mxu3 %v715_v44 }
 0x1da   :  { %v719_v48 = vpop.eup %718  ;;  %592 = vmatpush.msrb.mxu0 %v717_v45  ;;  %668 = vmatpush.msrb.mxu2 %v717_v45 }
 0x1db   :  { %615 = vmatpush.msrb.mxu1 %v719_v48  ;;  %672 = vmatpush.msrb.mxu3 %v719_v48 }
 0x1dc   :  { %661 = vmatmul.msk.f32.vlgmr.msrb.gmra.mxu0 %vm328_vm7, %v557_v46  ;;  %662 = vmatmul.msk.f32.vlgmr.msrb.gmra.mxu2 %vm328_vm7, %v558_v47 }
 0x1dd   :  { %663 = vmatmul.msk.f32.vlgmr.msrb.gmra.mxu1 %vm328_vm7, %v557_v46  ;;  %664 = vmatmul.msk.f32.vlgmr.msrb.gmra.mxu3 %vm328_vm7, %v558_v47 }
 0x259   :  { %v594_v50 = vpop.f32.mrf.mxu0 }
 0x25a   :  { %v595_v51 = vadd.f32 %v594_v50, %v564_v49  ;;  %v617_v52 = vpop.f32.mrf.mxu1 }
 0x25b   :  { %v618_v53 = vadd.f32 %v617_v52, %v564_v49 }
 0x25c   :  { %623 = vst [vmem:[#allocation2] sm:$0xff] %v595_v51 }
 0x25d   :  { %624 = vst [vmem:[#allocation2 + $0x8] sm:$0xff] %v618_v53 }
 0x25f   :  { %v597_v55 = vpop.f32.mrf.mxu2 }
 0x260   :  { %v598_v56 = vadd.f32 %v597_v55, %v569_v54  ;;  %v620_v57 = vpop.f32.mrf.mxu3 }
 0x261   :  { %v621_v58 = vadd.f32 %v620_v57, %v569_v54 }
 0x262   :  { %625 = vst [vmem:[#allocation2 + $0x10] sm:$0xff] %v598_v56 }
 0x263   :  { %626 = vst [vmem:[#allocation2 + $0x18] sm:$0xff] %v621_v58 }
 0x264   :  { %639 = dma.vmem_to_hbm [thread:$0]  %s632_s24, 512, %s634_s27, [#allocation3], %s748_s4, %s748_s4, %s749_s28  }
 0x265   :  { %744 = dma.done.wait [#allocation3], 512  }
 0x266   :  { %745 = vsyncadd [#allocation3], 4294966784 }
 0x267   :  { %644 = vsyncpa [#allocation3], 1 }

</bundles_post_ra>
